<compile_context>
chip_gen: v7x
topology: tpu7x:2x2x1
jax: 0.10.0
libtpu: 0.0.40
codegen_flags: <defaults>
</compile_context>

<pallas_src>
import jax
import jax.numpy as jnp
from jax.experimental import pallas as pl
from jax.experimental.pallas import tpu as pltpu


def _round_up(a, b):
    return -(-a // b) * b


# ----------------------------- kernels ------------------------------------ #

def _gated_gelu_kernel_fullk(x_ref, w_ref, bg_ref, o_ref):
    """Single-pass (no k axis): matmul + bias + gate + approximate GELU (f32 epilogue)."""
    y = jnp.dot(x_ref[...], w_ref[...], preferred_element_type=jnp.float32)
    bias = bg_ref[0:1, :]                     # (1, tn) broadcasts over rows
    gate = bg_ref[1:2, :]                     # (1, tn)
    y = (y + bias) * gate
    o_ref[...] = (y * jax.nn.sigmoid(1.702 * y)).astype(o_ref.dtype)


def _gated_gelu_kernel_splitk(x_ref, w_ref, bg_ref, o_ref, acc_ref):
    """K split across the last grid axis; f32 accumulator, epilogue on the last k step."""
    k = pl.program_id(2)

    @pl.when(k == 0)
    def _():
        acc_ref[...] = jnp.zeros_like(acc_ref)

    acc_ref[...] += jnp.dot(x_ref[...], w_ref[...], preferred_element_type=jnp.float32)

    @pl.when(k == pl.num_programs(2) - 1)
    def _():
        bias = bg_ref[0:1, :]
        gate = bg_ref[1:2, :]
        y = (acc_ref[...] + bias) * gate
        o_ref[...] = (y * jax.nn.sigmoid(1.702 * y)).astype(o_ref.dtype)


# ----------------------------- VMEM budget --------------------------------- #

def _vmem_budget():
    """Generation-aware scoped-VMEM limit and tile-buffer budget."""
    cap = None
    try:
        info = pltpu.get_tpu_info()
        cap = getattr(info, "vmem_capacity_bytes", None)
    except Exception:
        cap = None
    if not cap:
        cap = 64 * 2**20                       # conservative: v7x per-TC VMEM
    cap = int(cap)
    # 128 MiB parts -> 96 MiB scoped limit; 64 MiB parts (v7x) -> 32 MiB.
    limit = max(32 * 2**20, min(96 * 2**20, cap - 32 * 2**20))
    budget = int(limit * 0.8)                  # headroom for Pallas internal scratch / sems
    return budget, limit


# ----------------------------- prepare (weight-side, one-time) ------------- #

def prepare_gated_gelu_params(w, b, gate, *, gate_width, compute_dtype=jnp.bfloat16):
    """
    One-time weight-side prep: cast W to the compute dtype, pad to tile multiples,
    and pack bias + expanded width-gate into a single (2, N_pad) f32 array.

    w    : (dim_in, dim_out)   (transposed vs. PyTorch's (dim_out, dim_in))
    b    : (dim_out,)
    gate : (gate_width,)
    """
    dim_in, dim_out = w.shape
    assert dim_out % gate_width == 0
    group = dim_out // gate_width

    budget, limit = _vmem_budget()
    w_bpe = jnp.dtype(compute_dtype).itemsize
    x_bpe = w_bpe

    # tn: fixed large lane-dense tile; pad N up to it as long as padding waste <= 25%.
    n_min = _round_up(dim_out, 128)
    tn = 128
    for t in (512, 384, 256, 128):
        if _round_up(dim_out, t) * 4 <= n_min * 5:
            tn = t
            break
    N_pad = _round_up(dim_out, tn)

    # full-K vs split-K decision (double-buffered tile bytes at the smallest tm=128).
    K_pad = _round_up(dim_in, 128)

    def _fullk_bytes(tm, k):
        return 2 * (tm * k * x_bpe + k * tn * w_bpe + tm * tn * 4 + 2 * tn * 4)

    split_k = _fullk_bytes(128, K_pad) > budget
    if not split_k:
        tk = K_pad
    else:
        # Large K chunks; pad K up to the chunk (<=25% waste) instead of collapsing to 128.
        tk = 128
        for t in (2048, 1024, 512, 256, 128):
            if _round_up(dim_in, t) * 4 > K_pad * 5:
                continue
            if _fullk_bytes(128, t) + 128 * tn * 4 <= budget:
                tk = t
                break
        K_pad = _round_up(dim_in, tk)

    # Weight-side tensors: cast + pad exactly once.
    w_p = w.astype(compute_dtype)
    if (K_pad, N_pad) != (dim_in, dim_out):
        w_p = jnp.pad(w_p, ((0, K_pad - dim_in), (0, N_pad - dim_out)))

    gate_full = jnp.repeat(gate.astype(jnp.float32), group)   # contiguous channel groups
    bg = jnp.stack([b.astype(jnp.float32), gate_full], axis=0)
    if N_pad != dim_out:
        bg = jnp.pad(bg, ((0, 0), (0, N_pad - dim_out)))

    return dict(w=w_p, bg=bg, dim_in=dim_in, dim_out=dim_out,
                K_pad=K_pad, N_pad=N_pad, tn=tn, tk=tk, split_k=split_k,
                compute_dtype=compute_dtype, budget=budget, limit=limit,
                x_bpe=x_bpe, w_bpe=w_bpe)


# ----------------------------- apply (per-call) ----------------------------- #

def gated_approximate_gelu_apply(x, params):
    """x: (B, S, dim_in) -> (B, S, dim_out)."""
    B, S, dim_in = x.shape
    assert dim_in == params["dim_in"]
    dim_out = params["dim_out"]
    K_pad, N_pad = params["K_pad"], params["N_pad"]
    tn, tk = params["tn"], params["tk"]
    split_k = params["split_k"]
    budget, limit = params["budget"], params["limit"]
    x_bpe, w_bpe = params["x_bpe"], params["w_bpe"]
    out_dtype = x.dtype

    M = B * S
    x2d = x.reshape(M, dim_in).astype(params["compute_dtype"])

    # ---- tm: biggest row tile fitting the budget; 16-row granularity (bf16 packing) ----
    def _bytes_for(tm):
        by = 2 * (tm * tk * x_bpe + tk * tn * w_bpe + tm * tn * 4 + 2 * tn * 4)
        if split_k:
            by += tm * tn * 4
        return by

    if M <= 512:
        tm = _round_up(M, 16)
        while tm > 16 and _bytes_for(tm) > budget:
            tm -= 16
    else:
        tm = 128
        for t in (512, 384, 256, 128):
            if _bytes_for(t) <= budget:
                tm = t
                break

    grid_n = N_pad // tn
    M_pad = _round_up(M, tm)
    grid_m = M_pad // tm

    # v7x megacore: keep >=2 steps on a parallel axis when the problem is big enough.
    if grid_m == 1 and grid_n == 1 and M > 256:
        tm = _round_up(-(-M // 2), 16)
        M_pad = _round_up(M, tm)
        grid_m = M_pad // tm

    # ---- activation padding (zero rows/cols contribute nothing to the matmul) ----
    if (M_pad, K_pad) != x2d.shape:
        x2d = jnp.pad(x2d, ((0, M_pad - M), (0, K_pad - dim_in)))

    if not split_k:
        # Pick the grid order minimizing HBM traffic:
        #   N-inner: x streamed once, W re-streamed grid_m times.
        #   M-inner: W streamed once, x re-streamed grid_n times.
        x_bytes = M_pad * K_pad * x_bpe
        w_bytes = K_pad * N_pad * w_bpe
        m_inner = (w_bytes + x_bytes * grid_n) < (x_bytes + w_bytes * grid_m)
        if m_inner:
            grid = (grid_n, grid_m)
            x_map = lambda j, i: (i, 0)
            w_map = lambda j, i: (0, j)
            bg_map = lambda j, i: (0, j)
            o_map = lambda j, i: (i, j)
        else:
            grid = (grid_m, grid_n)
            x_map = lambda i, j: (i, 0)
            w_map = lambda i, j: (0, j)
            bg_map = lambda i, j: (0, j)
            o_map = lambda i, j: (i, j)

        out2d = pl.pallas_call(
            _gated_gelu_kernel_fullk,
            out_shape=jax.ShapeDtypeStruct((M_pad, N_pad), out_dtype),
            grid_spec=pltpu.PrefetchScalarGridSpec(
                num_scalar_prefetch=0,
                grid=grid,
                in_specs=[
                    pl.BlockSpec((tm, K_pad), x_map),    # x rows, full K
                    pl.BlockSpec((K_pad, tn), w_map),    # W column slab
                    pl.BlockSpec((2, tn), bg_map),       # [bias; gate]
                ],
                out_specs=pl.BlockSpec((tm, tn), o_map),
            ),
            compiler_params=pltpu.CompilerParams(
                dimension_semantics=("parallel", "parallel"),
                vmem_limit_bytes=limit,
            ),
        )(x2d, params["w"], params["bg"])
    else:
        grid_k = K_pad // tk
        out2d = pl.pallas_call(
            _gated_gelu_kernel_splitk,
            out_shape=jax.ShapeDtypeStruct((M_pad, N_pad), out_dtype),
            grid_spec=pltpu.PrefetchScalarGridSpec(
                num_scalar_prefetch=0,
                grid=(grid_m, grid_n, grid_k),
                in_specs=[
                    pl.BlockSpec((tm, tk), lambda i, j, k: (i, k)),
                    pl.BlockSpec((tk, tn), lambda i, j, k: (k, j)),
                    pl.BlockSpec((2, tn), lambda i, j, k: (0, j)),
                ],
                out_specs=pl.BlockSpec((tm, tn), lambda i, j, k: (i, j)),
                scratch_shapes=[pltpu.VMEM((tm, tn), jnp.float32)],
            ),
            compiler_params=pltpu.CompilerParams(
                dimension_semantics=("parallel", "parallel", "arbitrary"),
                vmem_limit_bytes=limit,
            ),
        )(x2d, params["w"], params["bg"])

    if (M_pad, N_pad) != (M, dim_out):
        out2d = out2d[:M, :dim_out]
    return out2d.reshape(B, S, dim_out)


def gated_approximate_gelu(x, w, b, gate, *, gate_width, compute_dtype=jnp.bfloat16):
    """Convenience wrapper: prepare (weight-side) + apply in one call."""
    params = prepare_gated_gelu_params(w, b, gate, gate_width=gate_width,
                                       compute_dtype=compute_dtype)
    return gated_approximate_gelu_apply(x, params)


# ----------------------------- demo / check -------------------------------- #

if __name__ == "__main__":
    # Small shapes consistent with the module: batch=2, seq=8, dim_in=256, dim_out=256.
    B, S, dim_in, dim_out, gate_width = 2, 8, 256, 256, 32

    key = jax.random.PRNGKey(0)
    kx, kw, kb, kg = jax.random.split(key, 4)

    x = jax.random.normal(kx, (B, S, dim_in), dtype=jnp.float32)
    w = jax.random.normal(kw, (dim_in, dim_out), dtype=jnp.float32) * (dim_in ** -0.5)
    b = jax.random.normal(kb, (dim_out,), dtype=jnp.float32) * 0.01
    # WidthGate initializes to ones; use non-trivial values to exercise the gating path.
    gate = 0.5 + jax.random.uniform(kg, (gate_width,), dtype=jnp.float32)

    out = gated_approximate_gelu(x, w, b, gate, gate_width=gate_width)
    out = jax.block_until_ready(out)

    # Reference in matching precision: bf16 operands, f32 accumulation, f32 epilogue.
    group = dim_out // gate_width
    xb = x.astype(jnp.bfloat16).astype(jnp.float32)
    wb = w.astype(jnp.bfloat16).astype(jnp.float32)
    y = jnp.einsum("bsd,df->bsf", xb, wb) + b
    y = y * jnp.repeat(gate, group)
    ref = y * jax.nn.sigmoid(1.702 * y)

    assert out.shape == (B, S, dim_out)
    assert jnp.allclose(out, ref, atol=2e-3, rtol=2e-3), "mismatch vs reference"

    print("KERNEL_OK")
</pallas_src>

<mosaic_0001>
module attributes {stable_mosaic.version = 11 : i64} {
  func.func @_gated_gelu_kernel_fullk(%arg0: i32, %arg1: i32, %arg2: memref<16x256xbf16, #tpu.memory_space<vmem>>, %arg3: memref<256x256xbf16, #tpu.memory_space<vmem>>, %arg4: memref<2x256xf32, #tpu.memory_space<vmem>>, %arg5: memref<16x256xf32, #tpu.memory_space<vmem>>) attributes {dimension_semantics = [#tpu.dimension_semantics<parallel>, #tpu.dimension_semantics<parallel>], iteration_bounds = array<i64: 1, 1>, scalar_prefetch = 0 : i64, scratch_operands = 0 : i64, tpu.core_type = #tpu.core_type<tc>, window_params = [{transform_indices = @transform_0, window_bounds = array<i64: 16, 256>}, {transform_indices = @transform_1, window_bounds = array<i64: 256, 256>}, {transform_indices = @transform_2, window_bounds = array<i64: 2, 256>}, {transform_indices = @transform_3, window_bounds = array<i64: 16, 256>}]} {
    %c0 = arith.constant 0 : index
    %c0_0 = arith.constant 0 : index
    %0 = vector.load %arg2[%c0, %c0_0] : memref<16x256xbf16, #tpu.memory_space<vmem>>, vector<16x256xbf16>
    %c0_1 = arith.constant 0 : index
    %c0_2 = arith.constant 0 : index
    %1 = vector.load %arg3[%c0_1, %c0_2] : memref<256x256xbf16, #tpu.memory_space<vmem>>, vector<256x256xbf16>
    %cst = arith.constant dense<0.000000e+00> : vector<16x256xf32>
    %2 = tpu.matmul %0, %1, %cst {dimension_numbers = #tpu.dot_dimension_numbers<[1], [0], [0], [1], [0, 0, 1, 1], [], []>} : vector<16x256xbf16>, vector<256x256xbf16>, vector<16x256xf32> -> vector<16x256xf32>
    %c0_3 = arith.constant 0 : index
    %c0_4 = arith.constant 0 : index
    %3 = vector.load %arg4[%c0_3, %c0_4] : memref<2x256xf32, #tpu.memory_space<vmem>>, vector<1x256xf32>
    %c1 = arith.constant 1 : index
    %c0_5 = arith.constant 0 : index
    %4 = vector.load %arg4[%c1, %c0_5] : memref<2x256xf32, #tpu.memory_space<vmem>>, vector<1x256xf32>
    %5 = vector.broadcast %3 : vector<1x256xf32> to vector<16x256xf32>
    %6 = arith.addf %2, %5 : vector<16x256xf32>
    %7 = vector.broadcast %4 : vector<1x256xf32> to vector<16x256xf32>
    %8 = arith.mulf %6, %7 : vector<16x256xf32>
    %cst_6 = arith.constant 1.702000e+00 : f32
    %9 = vector.broadcast %cst_6 : f32 to vector<16x256xf32>
    %10 = arith.mulf %9, %8 : vector<16x256xf32>
    %11 = arith.negf %10 : vector<16x256xf32>
    %12 = math.exp %11 : vector<16x256xf32>
    %cst_7 = arith.constant 1.000000e+00 : f32
    %13 = vector.broadcast %cst_7 : f32 to vector<16x256xf32>
    %14 = arith.addf %13, %12 : vector<16x256xf32>
    %15 = arith.divf %13, %14 : vector<16x256xf32>
    %16 = arith.mulf %8, %15 : vector<16x256xf32>
    %c0_8 = arith.constant 0 : index
    %c0_9 = arith.constant 0 : index
    %17 = vector.load %arg5[%c0_8, %c0_9] : memref<16x256xf32, #tpu.memory_space<vmem>>, vector<16x256xf32>
    tpu.vector_store %arg5[%c0_8, %c0_9], %16 {strides = array<i32>} : memref<16x256xf32, #tpu.memory_space<vmem>>, vector<16x256xf32>,
    return
  }
  func.func @transform_0(%arg0: i32, %arg1: i32) -> (i32, i32) {
    %c0_i32 = arith.constant 0 : i32
    %c0_i32_0 = arith.constant 0 : i32
    return %arg0, %c0_i32 : i32, i32
  }
  func.func @transform_1(%arg0: i32, %arg1: i32) -> (i32, i32) {
    %c0_i32 = arith.constant 0 : i32
    %c0_i32_0 = arith.constant 0 : i32
    return %c0_i32, %arg1 : i32, i32
  }
  func.func @transform_2(%arg0: i32, %arg1: i32) -> (i32, i32) {
    %c0_i32 = arith.constant 0 : i32
    %c0_i32_0 = arith.constant 0 : i32
    return %c0_i32, %arg1 : i32, i32
  }
  func.func @transform_3(%arg0: i32, %arg1: i32) -> (i32, i32) {
    %c0_i32 = arith.constant 0 : i32
    return %arg0, %arg1 : i32, i32
  }
}

</mosaic_0001>

<bundles_post_ra>
// kernel: tpu_custom_call.1
= control target key start
LH: loop header
LB: loop body
LE: loop exit
PB: predicated region body
PF: predicated region fallthrough
CT: control target
= control target key end

     0   :  { %8 = vsyncpa [#allocation3], 0  ;;  %s627_s0 = inlined_call_operand.hbm [shape: bf16[16,256], index: 0, kind: input, shape index: {}]   ;;  %s628_s1 = inlined_call_operand.hbm [shape: bf16[256,256], index: 1, kind: input, shape index: {}]   ;;  %s629_s2 = inlined_call_operand.vmem [shape: f32[2,256], index: 2, kind: input, shape index: {}]   ;;  %s630_s3 = inlined_call_operand.hbm [shape: f32[16,256], index: 3, kind: output, shape index: {}]  }
   0x1   :  { %9 = vsyncpa [#allocation6], 0 }
   0x2   :  { %10 = vsyncpa [#allocation4], 0  ;;  %s558_s12 = smov [#allocation2]   ;;  %s486_s16 = scalar_lea.hbm %s627_s0, 256 }
   0x3   :  { %s16_s13 = sshll.u32 %s558_s12, 4  ;;  %p487_p0 = scmp.ne.s32.totalorder %s627_s0, %s486_s16  ;;  %s17_s13 = int_to_ptr.vmem [resolvable:$true] %s16_s13 }
   0x4   :  { %p490_p1 = scmp.lt.u32.totalorder %s486_s16, %s627_s0 }
   0x6   :  { %p492_p2 = pnand %p490_p1, %p487_p0 }
   0x8   :  { %495 = shalt.err (!%p492_p2)
}
   0x9   :  { %s496_s21 = scalar_lea.vmem %s17_s13, 256  ;;  %p501_p4 = scmp.lt.s32.totalorder %s17_s13, %s17_s13 }
   0xa   :  { %p497_p3 = scmp.ne.s32.totalorder %s17_s13, %s496_s21  ;;  %p502_p5 = scmp.lt.s32.totalorder %s496_s21, %s496_s21 }
   0xc   :  { %p503_p6 = por %p502_p5, %p501_p4 }
   0xe   :  { %p504_p7 = pnand %p503_p6, %p497_p3 }
  0x10   :  { %507 = shalt.err (!%p504_p7)
}
  0x11   :  { %s559_s22 = smov 128   ;;  %s560_s23 = smov 8  }
  0x12   :  { %22 = dma.hbm_to_vmem [thread:$0]  %s627_s0, 256, %s17_s13, [#allocation3], %s559_s22, %s559_s22, %s560_s23  }
  0x13   :  { %s561_s26 = smov [#allocation5]   ;;  %s508_s30 = scalar_lea.hbm %s628_s1, 4096 }
  0x14   :  { %s28_s27 = sshll.u32 %s561_s26, 4  ;;  %p509_p8 = scmp.ne.s32.totalorder %s628_s1, %s508_s30  ;;  %s29_s27 = int_to_ptr.vmem [resolvable:$true] %s28_s27 }
  0x15   :  { %p512_p9 = scmp.lt.u32.totalorder %s508_s30, %s628_s1 }
  0x17   :  { %p514_p10 = pnand %p512_p9, %p509_p8 }
  0x19   :  { %517 = shalt.err (!%p514_p10)
}
  0x1a   :  { %s518_s8 = scalar_lea.vmem %s29_s27, 4096  ;;  %p523_p12 = scmp.lt.s32.totalorder %s29_s27, %s29_s27 }
  0x1b   :  { %p519_p11 = scmp.ne.s32.totalorder %s29_s27, %s518_s8  ;;  %p524_p13 = scmp.lt.s32.totalorder %s518_s8, %s518_s8 }
  0x1d   :  { %p525_p0 = por %p524_p13, %p523_p12 }
  0x1f   :  { %p526_p1 = pnand %p525_p0, %p519_p11 }
  0x21   :  { %529 = shalt.err (!%p526_p1)
}
  0x22   :  { %34 = dma.hbm_to_vmem [thread:$0]  %s628_s1, 4096, %s29_s27, [#allocation6], %s559_s22, %s559_s22, %s560_s23  }
  0x23   :  { %552 = dma.done.wait [#allocation3], 256  }
  0x24   :  { %553 = vsyncadd [#allocation3], 4294967040 }
  0x25   :  { %554 = dma.done.wait [#allocation6], 4096  }
  0x26   :  { %555 = vsyncadd [#allocation6], 4294963200  ;;  %v419_v0 = vld [vmem:[#allocation5 + $0x4] ss:$8 sps:$4 sm:$0xff]   ;;  %v421_v1 = vld [vmem:[#allocation5] ss:$8 sps:$4 sm:$0xff]   ;;  %v81_v34 = vlaneseq }
  0x27   :  { %261 = vmatprep.subr.bf16.mxu0 %v419_v0  ;;  %v422_v2 = vld [vmem:[#allocation5 + $0x14] ss:$8 sps:$4 sm:$0xff]   ;;  %v424_v3 = vld [vmem:[#allocation5 + $0x10] ss:$8 sps:$4 sm:$0xff]   ;;  %v425_v4 = vld [vmem:[#allocation5 + $0x24] ss:$8 sps:$4 sm:$0xff]  }
  0x28   :  { %262 = vmatpush1.bf16.msra.mxu0 %v421_v1  ;;  %v427_v5 = vld [vmem:[#allocation5 + $0x20] ss:$8 sps:$4 sm:$0xff]   ;;  %v428_v6 = vld [vmem:[#allocation5 + $0x34] ss:$8 sps:$4 sm:$0xff]   ;;  %v430_v7 = vld [vmem:[#allocation5 + $0x30] ss:$8 sps:$4 sm:$0xff]  }
  0x29   :  { %263 = vmatprep.subr.bf16.mxu0 %v422_v2  ;;  %v431_v8 = vld [vmem:[#allocation5 + $0x44] ss:$8 sps:$4 sm:$0xff]   ;;  %v433_v9 = vld [vmem:[#allocation5 + $0x40] ss:$8 sps:$4 sm:$0xff]   ;;  %v434_v10 = vld [vmem:[#allocation5 + $0x54] ss:$8 sps:$4 sm:$0xff]  }
  0x2a   :  { %v436_v11 = vld [vmem:[#allocation5 + $0x50] ss:$8 sps:$4 sm:$0xff]   ;;  %v437_v12 = vld [vmem:[#allocation5 + $0x64] ss:$8 sps:$4 sm:$0xff]   ;;  %v469_v13 = vld [vmem:[#allocation2 + $0x4] ss:$8 sps:$4 sm:$0xff]  }
  0x2b   :  { %v439_v14 = vld [vmem:[#allocation5 + $0x60] ss:$8 sps:$4 sm:$0xff]   ;;  %v440_v15 = vld [vmem:[#allocation5 + $0x74] ss:$8 sps:$4 sm:$0xff]   ;;  %293 = vmatprep.mubr.bf16.mxu0 %v469_v13  ;;  %v442_v16 = vld [vmem:[#allocation5 + $0x70] ss:$8 sps:$4 sm:$0xff]  }
  0x2c   :  { %264 = vmatpush1.bf16.msra.mxu0 %v424_v3  ;;  %v443_v17 = vld [vmem:[#allocation5 + $0x84] ss:$8 sps:$4 sm:$0xff]   ;;  %v445_v18 = vld [vmem:[#allocation5 + $0x80] ss:$8 sps:$4 sm:$0xff]   ;;  %v446_v19 = vld [vmem:[#allocation5 + $0x94] ss:$8 sps:$4 sm:$0xff]  }
  0x2d   :  { %265 = vmatprep.subr.bf16.mxu0 %v425_v4  ;;  %v448_v20 = vld [vmem:[#allocation5 + $0x90] ss:$8 sps:$4 sm:$0xff]   ;;  %v449_v21 = vld [vmem:[#allocation5 + $0xa4] ss:$8 sps:$4 sm:$0xff]   ;;  %v451_v22 = vld [vmem:[#allocation5 + $0xa0] ss:$8 sps:$4 sm:$0xff]  }
  0x2e   :  { %v452_v23 = vld [vmem:[#allocation5 + $0xb4] ss:$8 sps:$4 sm:$0xff]   ;;  %v454_v24 = vld [vmem:[#allocation5 + $0xb0] ss:$8 sps:$4 sm:$0xff]   ;;  %v455_v25 = vld [vmem:[#allocation5 + $0xc4] ss:$8 sps:$4 sm:$0xff]  }
  0x2f   :  { %v457_v26 = vld [vmem:[#allocation5 + $0xc0] ss:$8 sps:$4 sm:$0xff]   ;;  %v458_v27 = vld [vmem:[#allocation5 + $0xd4] ss:$8 sps:$4 sm:$0xff]   ;;  %v460_v28 = vld [vmem:[#allocation5 + $0xd0] ss:$8 sps:$4 sm:$0xff]  }
  0x30   :  { %266 = vmatpush1.bf16.msra.mxu0 %v427_v5  ;;  %v461_v29 = vld [vmem:[#allocation5 + $0xe4] ss:$8 sps:$4 sm:$0xff]   ;;  %v463_v30 = vld [vmem:[#allocation5 + $0xe0] ss:$8 sps:$4 sm:$0xff]   ;;  %v464_v31 = vld [vmem:[#allocation5 + $0xf4] ss:$8 sps:$4 sm:$0xff]  }
  0x31   :  { %267 = vmatprep.subr.bf16.mxu0 %v428_v6  ;;  %v466_v32 = vld [vmem:[#allocation5 + $0xf0] ss:$8 sps:$4 sm:$0xff]   ;;  %v82_v35 = vshrl.u32 %v81_v34, 7 }
  0x32   :  { %v467_v33 = vld [vmem:[#allocation2] ss:$8 sps:$4 sm:$0xff]  }
  0x33   :  { %v83_v36 = vsub.s32 0, %v82_v35  ;;  %v77_v37 = vld [vmem:[%s629_s2] ss:$2 sm:$0x3]  ;;  %v87_v38 = vsub.s32 1, %v82_v35 }
  0x34   :  { %268 = vmatpush1.bf16.msra.mxu0 %v430_v7  ;;  %v373_v39 = vld [vmem:[%s629_s2 + $0x1] ss:$2 sm:$0x3]  ;;  %s562_s2 = smov [#allocation7]  }
  0x35   :  { %269 = vmatprep.subr.bf16.mxu0 %v431_v8  ;;  %v84_v40 = vrot.slane %v77_v37, %v83_v36  ;;  %v88_v41 = vrot.slane %v77_v37, %v87_v38  ;;  %v308_v42 = vrot.slane %v373_v39, %v83_v36  ;;  %v312_v44 = vrot.slane %v373_v39, %v87_v38  ;;  %s360_s13 = sshll.u32 %s562_s2, 4  ;;  %s361_s13 = int_to_ptr.vmem [resolvable:$true] %s360_s13 }
  0x36   :  { %s530_s14 = scalar_lea.vmem %s361_s13, 512  ;;  %p535_p3 = scmp.lt.s32.totalorder %s361_s13, %s361_s13 }
  0x37   :  { %p531_p2 = scmp.ne.s32.totalorder %s361_s13, %s530_s14  ;;  %p536_p4 = scmp.lt.s32.totalorder %s530_s14, %s530_s14 }
  0x38   :  { %270 = vmatpush1.bf16.msra.mxu0 %v433_v9 }
  0x39   :  { %271 = vmatprep.subr.bf16.mxu0 %v434_v10  ;;  %p537_p5 = por %p536_p4, %p535_p3 }
  0x3b   :  { %p538_p6 = pnand %p537_p5, %p531_p2 }
  0x3c   :  { %272 = vmatpush1.bf16.msra.mxu0 %v436_v11 }
  0x3d   :  { %273 = vmatprep.subr.bf16.mxu0 %v437_v12 }
  0x40   :  { %274 = vmatpush1.bf16.msra.mxu0 %v439_v14 }
  0x41   :  { %275 = vmatprep.subr.bf16.mxu0 %v440_v15 }
  0x44   :  { %276 = vmatpush1.bf16.msra.mxu0 %v442_v16 }
  0x45   :  { %277 = vmatprep.subr.bf16.mxu0 %v443_v17 }
  0x48   :  { %278 = vmatpush1.bf16.msra.mxu0 %v445_v18 }
  0x49   :  { %279 = vmatprep.subr.bf16.mxu0 %v446_v19 }
  0x4c   :  { %280 = vmatpush1.bf16.msra.mxu0 %v448_v20 }
  0x4d   :  { %281 = vmatprep.subr.bf16.mxu0 %v449_v21 }
  0x50   :  { %282 = vmatpush1.bf16.msra.mxu0 %v451_v22 }
  0x51   :  { %283 = vmatprep.subr.bf16.mxu0 %v452_v23 }
  0x54   :  { %284 = vmatpush1.bf16.msra.mxu0 %v454_v24 }
  0x55   :  { %285 = vmatprep.subr.bf16.mxu0 %v455_v25 }
  0x58   :  { %286 = vmatpush1.bf16.msra.mxu0 %v457_v26 }
  0x59   :  { %287 = vmatprep.subr.bf16.mxu0 %v458_v27 }
  0x5c   :  { %288 = vmatpush1.bf16.msra.mxu0 %v460_v28 }
  0x5d   :  { %289 = vmatprep.subr.bf16.mxu0 %v461_v29 }
  0x60   :  { %290 = vmatpush1.bf16.msra.mxu0 %v463_v30 }
  0x61   :  { %291 = vmatprep.subr.bf16.mxu0 %v464_v31 }
  0x64   :  { %292 = vmatpush1.bf16.msra.mxu0 %v466_v32 }
  0x67   :  { %294 = vmatmul.mubr.bf16.vlgmr.msra.gmra.mrb[0].mxu0 %v467_v33 }
 0x13a   :  { %v295_v43 = vpop.f32.mrb[0].mxu0 }
 0x13b   :  { %v296_v45 = vadd.f32 %v295_v43, %v84_v40  ;;  %v297_v46 = vpop.f32.mrb[1].mxu0 }
 0x13c   :  { %v298_v47 = vadd.f32 %v297_v46, %v88_v41  ;;  %v299_v48 = vpop.f32.mrb[2].mxu0 }
 0x13d   :  { %v315_v49 = vmul.f32 %v308_v42, %v296_v45  ;;  %v300_v50 = vadd.f32 %v299_v48, %v84_v40  ;;  %v301_v51 = vpop.f32.mrb[3].mxu0 }
 0x13e   :  { %v316_v52 = vmul.f32 %v312_v44, %v298_v47  ;;  %v302_v53 = vadd.f32 %v301_v51, %v88_v41 }
 0x13f   :  { %v408_v54 = vmul.f32 -1.702, %v315_v49  ;;  %v317_v55 = vmul.f32 %v308_v42, %v300_v50 }
 0x140   :  { %v409_v56 = vmul.f32 -1.702, %v316_v52  ;;  %v318_v57 = vmul.f32 %v312_v44, %v302_v53 }
 0x141   :  { %v327_v58 = vmul.f32 1.442695, %v408_v54  ;;  %v410_v59 = vmul.f32 -1.702, %v317_v55 }
 0x142   :  { %v329_v60 = vmul.f32 1.442695, %v409_v56  ;;  %v411_v61 = vmul.f32 -1.702, %v318_v57 }
 0x143   :  { %470 = vpow2.f32 %v327_v58  ;;  %v331_v62 = vmul.f32 1.442695, %v410_v59 }
 0x144   :  { %472 = vpow2.f32 %v329_v60  ;;  %v333_v63 = vmul.f32 1.442695, %v411_v61 }
 0x145   :  { %474 = vpow2.f32 %v331_v62 }
 0x146   :  { %476 = vpow2.f32 %v333_v63 }
 0x14d   :  { %v471_v0 = vpop.eup %470 }
 0x14e   :  { %v473_v1 = vpop.eup %472  ;;  %v335_v2 = vadd.f32 1.0, %v471_v0 }
 0x14f   :  { %v475_v3 = vpop.eup %474  ;;  %v336_v4 = vadd.f32 1.0, %v473_v1 }
 0x150   :  { %v477_v5 = vpop.eup %476  ;;  %478 = vrcp.f32 %v335_v2  ;;  %v337_v6 = vadd.f32 1.0, %v475_v3 }
 0x151   :  { %480 = vrcp.f32 %v336_v4  ;;  %v338_v7 = vadd.f32 1.0, %v477_v5 }
 0x152   :  { %482 = vrcp.f32 %v337_v6 }
 0x153   :  { %484 = vrcp.f32 %v338_v7 }
 0x15a   :  { %v479_v8 = vpop.eup %478 }
 0x15b   :  { %v481_v9 = vpop.eup %480  ;;  %v347_v10 = vmul.f32 %v479_v8, %v315_v49 }
 0x15c   :  { %v483_v11 = vpop.eup %482  ;;  %v348_v12 = vmul.f32 %v481_v9, %v316_v52 }
 0x15d   :  { %v485_v13 = vpop.eup %484  ;;  %351 = vst [vmem:[#allocation7] sm:$0xff] %v347_v10  ;;  %v349_v14 = vmul.f32 %v483_v11, %v317_v55 }
 0x15e   :  { %352 = vst [vmem:[#allocation7 + $0x8] sm:$0xff] %v348_v12  ;;  %v350_v15 = vmul.f32 %v485_v13, %v318_v57 }
 0x15f   :  { %353 = vst [vmem:[#allocation7 + $0x10] sm:$0xff] %v349_v14 }
 0x160   :  { %354 = vst [vmem:[#allocation7 + $0x18] sm:$0xff] %v350_v15 }
 0x161   :  { %541 = shalt.err (!%p538_p6)
}
 0x162   :  { %s542_s17 = scalar_lea.hbm %s630_s3, 512 }
 0x163   :  { %p543_p7 = scmp.ne.s32.totalorder %s630_s3, %s542_s17  ;;  %p546_p8 = scmp.lt.u32.totalorder %s542_s17, %s630_s3 }
 0x165   :  { %p548_p9 = pnand %p546_p8, %p543_p7 }
 0x167   :  { %551 = shalt.err (!%p548_p9)
}
 0x168   :  { %s563_s22 = smov 256   ;;  %s564_s23 = smov 16  }
 0x169   :  { %366 = dma.vmem_to_hbm [thread:$0]  %s361_s13, 512, %s630_s3, [#allocation4], %s563_s22, %s563_s22, %s564_s23  }
 0x16a   :  { %556 = dma.done.wait [#allocation4], 512  }
 0x16b   :  { %557 = vsyncadd [#allocation4], 4294966784 }
 0x16c   :  { %370 = vsyncpa [#allocation3], 1 }
 0x16d   :  { %371 = vsyncpa [#allocation6], 1 }
 0x16e   :  { %372 = vsyncpa [#allocation4], 1 }

</bundles_post_ra>
